<compile_context>
chip_gen: v5e
topology: v5e:2x2
jax: 0.10.0
libtpu: 0.0.40
codegen_flags: <defaults>
</compile_context>

<pallas_src>
import jax
import jax.numpy as jnp
from jax import lax
from jax.experimental import pallas as pl
from jax.experimental.pallas import tpu as pltpu


def _round_up(x, m):
    return (x + m - 1) // m * m


def _rec_kernel(uid_ref, iid_ref, tbl_t_ref, w_t_ref, out_ref):
    """One grid step = one block of TB examples (batch lives on lanes).

    uid_ref/iid_ref : VMEM (1, TB) int32 packed-table row ids (iid already
                      offset by usr_num; padded slots are -1 -> all-zero onehot).
    tbl_t_ref       : VMEM (K_pad, R_pad) bf16 transposed packed table.
    w_t_ref         : VMEM (2*H_pad, K_pad) bf16 transposed block-diag weights
                      (+ bias rows folded in via the table's 'ones' columns).
    out_ref         : VMEM (1, TB) f32 lane-dense scores for this block.
    """
    r_pad = tbl_t_ref.shape[1]
    tb = out_ref.shape[1]
    h_pad = w_t_ref.shape[0] // 2

    # ---- "gather" as a one-hot MXU pass (user + item rows are disjoint) ----
    row_ids = lax.broadcasted_iota(jnp.int32, (r_pad, tb), 0)
    hit = (row_ids == uid_ref[...]) | (row_ids == iid_ref[...])
    onehot = jnp.where(hit, 1.0, 0.0).astype(tbl_t_ref.dtype)       # (R_pad, TB) bf16

    # x_t = u_row + i_row laid out as [u_emb | i_emb | 1 | 1 | 0...] per column.
    x_t = jnp.dot(tbl_t_ref[...], onehot,
                  preferred_element_type=jnp.float32)               # (K_pad, TB) f32
    x_t = x_t.astype(w_t_ref.dtype)                                 # exact (selects bf16 rows)

    # ---- fused towers: single MXU pass over block-diagonal weights ----
    z_t = jnp.dot(w_t_ref[...], x_t,
                  preferred_element_type=jnp.float32)               # (2*H_pad, TB) f32
    z_t = jnp.maximum(z_t, 0.0)                                     # relu (f32 epilogue)

    u_feat = z_t[:h_pad, :]                                         # tile-aligned split
    i_feat = z_t[h_pad:, :]
    out_ref[...] = jnp.sum(u_feat * i_feat, axis=0, keepdims=True)  # (1, TB) lane-dense


def pack_params(params, compute_dtype=jnp.bfloat16):
    """One-time packing: fuse both towers into a single gatherable table plus a
    block-diagonal weight (biases folded in via two 'ones' columns), both
    stored transposed so the kernel can keep the batch on lanes."""
    user_emb, item_emb = params["user_emb"], params["item_emb"]
    Wu, bu, Wi, bi = params["Wu"], params["bu"], params["Wi"], params["bi"]
    U, Eu = user_emb.shape
    I, Ei = item_emb.shape
    H = Wu.shape[1]

    K = Eu + Ei + 2                          # + one bias column per tower
    K_pad = _round_up(K, 128)                # lane-aligned contraction dim
    R = U + I
    R_pad = _round_up(R, 128)                # lane-aligned table width (transposed)
    H_pad = _round_up(H, 128)                # each tower gets a full lane/sublane tile

    table = jnp.zeros((R_pad, K_pad), compute_dtype)
    table = table.at[:U, :Eu].set(user_emb.astype(compute_dtype))
    table = table.at[:U, Eu + Ei].set(1.0)                      # user bias column
    table = table.at[U:U + I, Eu:Eu + Ei].set(item_emb.astype(compute_dtype))
    table = table.at[U:U + I, Eu + Ei + 1].set(1.0)             # item bias column

    weights = jnp.zeros((K_pad, 2 * H_pad), compute_dtype)
    weights = weights.at[:Eu, :H].set(Wu.astype(compute_dtype))
    weights = weights.at[Eu:Eu + Ei, H_pad:H_pad + H].set(Wi.astype(compute_dtype))
    weights = weights.at[Eu + Ei, :H].set(bu.astype(compute_dtype))
    weights = weights.at[Eu + Ei + 1, H_pad:H_pad + H].set(bi.astype(compute_dtype))

    return {
        "table_t": jnp.asarray(table.T),      # (K_pad, R_pad)
        "weights_t": jnp.asarray(weights.T),  # (2*H_pad, K_pad)
        "usr_num": U,
    }


def rec_model_forward(uid_batch, iid_batch, packed, *, block_b=512):
    """Pallas forward of RecModel on packed params. Returns f32 (B,) scores."""
    table_t = packed["table_t"]        # (K_pad, R_pad)
    weights_t = packed["weights_t"]    # (2*H_pad, K_pad)
    usr_num = packed["usr_num"]

    assert block_b % 128 == 0, "block_b must be a multiple of 128 (lane-dense blocks)"
    B = uid_batch.shape[0]
    tb = min(block_b, _round_up(B, 128))          # always a multiple of 128
    b_pad = _round_up(B, tb)
    nb = b_pad // tb

    # Padded slots get id -1: never matches any table row -> zero onehot -> score 0.
    uid = jnp.full((b_pad,), -1, jnp.int32).at[:B].set(uid_batch.astype(jnp.int32))
    iid = jnp.full((b_pad,), -1, jnp.int32).at[:B].set(
        iid_batch.astype(jnp.int32) + usr_num)    # item rows live after user rows
    uid = uid.reshape(1, b_pad)
    iid = iid.reshape(1, b_pad)

    k_pad, r_pad = table_t.shape
    h2 = weights_t.shape[0]

    # VMEM-residency gate (small tables only; see TODO at top for the HBM path).
    table_bytes = table_t.size * table_t.dtype.itemsize
    assert table_bytes <= 16 * 1024 * 1024, (
        "packed table too large for the VMEM-resident path")

    cost = pl.CostEstimate(
        flops=int(2 * b_pad * r_pad * k_pad + 2 * b_pad * k_pad * h2),
        transcendentals=0,
        bytes_accessed=int(table_bytes
                           + weights_t.size * weights_t.dtype.itemsize
                           + b_pad * (4 + 4 + 4)),
    )

    out = pl.pallas_call(
        _rec_kernel,
        out_shape=jax.ShapeDtypeStruct((1, b_pad), jnp.float32),
        grid_spec=pltpu.PrefetchScalarGridSpec(
            num_scalar_prefetch=0,
            grid=(nb,),
            in_specs=[
                pl.BlockSpec((1, tb), lambda g: (0, g)),          # uid (lane-dense)
                pl.BlockSpec((1, tb), lambda g: (0, g)),          # iid (lane-dense)
                pl.BlockSpec((k_pad, r_pad), lambda g: (0, 0)),   # table VMEM-resident
                pl.BlockSpec((h2, k_pad), lambda g: (0, 0)),      # weights VMEM-resident
            ],
            out_specs=pl.BlockSpec((1, tb), lambda g: (0, g)),
        ),
        compiler_params=pltpu.CompilerParams(dimension_semantics=("parallel",)),
        cost_estimate=cost,
    )(uid, iid, table_t, weights_t)

    return out[0, :B]


def reference_forward(uid_batch, iid_batch, params):
    """Pure-JAX reference of the PyTorch forward."""
    u_emb = jnp.take(params["user_emb"], uid_batch, axis=0)
    i_emb = jnp.take(params["item_emb"], iid_batch, axis=0)
    u_feat = jax.nn.relu(u_emb @ params["Wu"] + params["bu"])
    i_feat = jax.nn.relu(i_emb @ params["Wi"] + params["bi"])
    return jnp.sum(u_feat * i_feat, axis=-1)


def init_params(key, usr_num, item_num, emb_usr_size, emb_item_size, hidden_size):
    k = jax.random.split(key, 6)
    user_emb = jax.random.normal(k[0], (usr_num, emb_usr_size), jnp.float32)
    item_emb = jax.random.normal(k[1], (item_num, emb_item_size), jnp.float32)
    lim_u = 1.0 / jnp.sqrt(emb_usr_size)
    lim_i = 1.0 / jnp.sqrt(emb_item_size)
    Wu = jax.random.uniform(k[2], (emb_usr_size, hidden_size), jnp.float32, -lim_u, lim_u)
    bu = jax.random.uniform(k[3], (hidden_size,), jnp.float32, -lim_u, lim_u)
    Wi = jax.random.uniform(k[4], (emb_item_size, hidden_size), jnp.float32, -lim_i, lim_i)
    bi = jax.random.uniform(k[5], (hidden_size,), jnp.float32, -lim_i, lim_i)
    return {"user_emb": user_emb, "item_emb": item_emb,
            "Wu": Wu, "bu": bu, "Wi": Wi, "bi": bi}


if __name__ == "__main__":
    usr_num, item_num = 50, 40
    emb_usr_size, emb_item_size, hidden_size = 16, 24, 32
    batch = 200                      # with block_b=128 pads to 2 blocks -> exercises the grid

    key = jax.random.PRNGKey(0)
    kp, ku, ki = jax.random.split(key, 3)
    params = init_params(kp, usr_num, item_num, emb_usr_size, emb_item_size, hidden_size)
    packed = pack_params(params, compute_dtype=jnp.bfloat16)

    uid_batch = jax.random.randint(ku, (batch,), 0, usr_num, dtype=jnp.int32)
    iid_batch = jax.random.randint(ki, (batch,), 0, item_num, dtype=jnp.int32)

    out = rec_model_forward(uid_batch, iid_batch, packed, block_b=128)
    out = jax.block_until_ready(out)

    # Reference with the same bf16 parameter rounding the kernel uses
    # (the MXU accumulates in f32, so this matches tightly).
    params_q = {k_: v.astype(jnp.bfloat16).astype(jnp.float32) for k_, v in params.items()}
    ref = reference_forward(uid_batch, iid_batch, params_q)

    assert out.shape == (batch,)
    assert jnp.allclose(out, ref, atol=2e-3, rtol=2e-3), (
        "mismatch vs reference: max abs err = "
        f"{jnp.max(jnp.abs(out - ref))}")

    print("KERNEL_OK")
</pallas_src>

<mosaic_0001>
module attributes {stable_mosaic.version = 11 : i64} {
  func.func @_rec_kernel(%arg0: i32, %arg1: memref<1x128xi32, #tpu.memory_space<vmem>>, %arg2: memref<1x128xi32, #tpu.memory_space<vmem>>, %arg3: memref<128x128xbf16, #tpu.memory_space<vmem>>, %arg4: memref<256x128xbf16, #tpu.memory_space<vmem>>, %arg5: memref<1x128xf32, #tpu.memory_space<vmem>>) attributes {dimension_semantics = [#tpu.dimension_semantics<parallel>], iteration_bounds = array<i64: 2>, scalar_prefetch = 0 : i64, scratch_operands = 0 : i64, tpu.core_type = #tpu.core_type<tc>, window_params = [{transform_indices = @transform_0, window_bounds = array<i64: 1, 128>}, {transform_indices = @transform_1, window_bounds = array<i64: 1, 128>}, {pipeline_mode = #tpu.pipeline_mode<synchronous>, transform_indices = @transform_2, window_bounds = array<i64: 128, 128>}, {pipeline_mode = #tpu.pipeline_mode<synchronous>, transform_indices = @transform_3, window_bounds = array<i64: 256, 128>}, {transform_indices = @transform_4, window_bounds = array<i64: 1, 128>}]} {
    %0 = tpu.iota {dimensions = array<i32: 0>} : vector<128x128xi32>
    %c0 = arith.constant 0 : index
    %c0_0 = arith.constant 0 : index
    %1 = vector.load %arg1[%c0, %c0_0] : memref<1x128xi32, #tpu.memory_space<vmem>>, vector<1x128xi32>
    %2 = vector.broadcast %1 : vector<1x128xi32> to vector<128x128xi32>
    %3 = arith.cmpi eq, %0, %2 : vector<128x128xi32>
    %c0_1 = arith.constant 0 : index
    %c0_2 = arith.constant 0 : index
    %4 = vector.load %arg2[%c0_1, %c0_2] : memref<1x128xi32, #tpu.memory_space<vmem>>, vector<1x128xi32>
    %5 = vector.broadcast %4 : vector<1x128xi32> to vector<128x128xi32>
    %6 = arith.cmpi eq, %0, %5 : vector<128x128xi32>
    %7 = arith.ori %3, %6 : vector<128x128xi1>
    %cst = arith.constant 1.000000e+00 : f32
    %cst_3 = arith.constant 0.000000e+00 : f32
    %8 = vector.broadcast %cst : f32 to vector<128x128xf32>
    %9 = vector.broadcast %cst_3 : f32 to vector<128x128xf32>
    %10 = arith.select %7, %8, %9 : vector<128x128xi1>, vector<128x128xf32>
    %11 = arith.truncf %10 : vector<128x128xf32> to vector<128x128xbf16>
    %c0_4 = arith.constant 0 : index
    %c0_5 = arith.constant 0 : index
    %12 = vector.load %arg3[%c0_4, %c0_5] : memref<128x128xbf16, #tpu.memory_space<vmem>>, vector<128x128xbf16>
    %cst_6 = arith.constant dense<0.000000e+00> : vector<128x128xf32>
    %13 = tpu.matmul %12, %11, %cst_6 {dimension_numbers = #tpu.dot_dimension_numbers<[1], [0], [0], [1], [0, 0, 1, 1], [], []>} : vector<128x128xbf16>, vector<128x128xbf16>, vector<128x128xf32> -> vector<128x128xf32>
    %14 = arith.truncf %13 : vector<128x128xf32> to vector<128x128xbf16>
    %c0_7 = arith.constant 0 : index
    %c0_8 = arith.constant 0 : index
    %15 = vector.load %arg4[%c0_7, %c0_8] : memref<256x128xbf16, #tpu.memory_space<vmem>>, vector<256x128xbf16>
    %cst_9 = arith.constant dense<0.000000e+00> : vector<256x128xf32>
    %16 = tpu.matmul %15, %14, %cst_9 {dimension_numbers = #tpu.dot_dimension_numbers<[1], [0], [0], [1], [0, 0, 1, 1], [], []>} : vector<256x128xbf16>, vector<128x128xbf16>, vector<256x128xf32> -> vector<256x128xf32>
    %cst_10 = arith.constant 0.000000e+00 : f32
    %17 = vector.broadcast %cst_10 : f32 to vector<256x128xf32>
    %18 = arith.maximumf %16, %17 : vector<256x128xf32>
    %19 = vector.extract_strided_slice %18 {offsets = [0, 0], sizes = [128, 128], strides = [1, 1]} : vector<256x128xf32> to vector<128x128xf32>
    %20 = vector.extract_strided_slice %18 {offsets = [128, 0], sizes = [128, 128], strides = [1, 1]} : vector<256x128xf32> to vector<128x128xf32>
    %21 = arith.mulf %19, %20 : vector<128x128xf32>
    %cst_11 = arith.constant dense<0.000000e+00> : vector<128xf32>
    %22 = vector.multi_reduction <add>, %21, %cst_11 [0] : vector<128x128xf32> to vector<128xf32>
    %23 = vector.shape_cast %22 : vector<128xf32> to vector<1x128xf32>
    %c0_12 = arith.constant 0 : index
    %c0_13 = arith.constant 0 : index
    %24 = vector.load %arg5[%c0_12, %c0_13] : memref<1x128xf32, #tpu.memory_space<vmem>>, vector<1x128xf32>
    tpu.vector_store %arg5[%c0_12, %c0_13], %23 {strides = array<i32>} : memref<1x128xf32, #tpu.memory_space<vmem>>, vector<1x128xf32>,
    return
  }
  func.func @transform_0(%arg0: i32) -> (i32, i32) {
    %c0_i32 = arith.constant 0 : i32
    %c0_i32_0 = arith.constant 0 : i32
    return %c0_i32, %arg0 : i32, i32
  }
  func.func @transform_1(%arg0: i32) -> (i32, i32) {
    %c0_i32 = arith.constant 0 : i32
    %c0_i32_0 = arith.constant 0 : i32
    return %c0_i32, %arg0 : i32, i32
  }
  func.func @transform_2(%arg0: i32) -> (i32, i32) {
    %c0_i32 = arith.constant 0 : i32
    %c0_i32_0 = arith.constant 0 : i32
    %c0_i32_1 = arith.constant 0 : i32
    return %c0_i32, %c0_i32_0 : i32, i32
  }
  func.func @transform_3(%arg0: i32) -> (i32, i32) {
    %c0_i32 = arith.constant 0 : i32
    %c0_i32_0 = arith.constant 0 : i32
    %c0_i32_1 = arith.constant 0 : i32
    return %c0_i32, %c0_i32_0 : i32, i32
  }
  func.func @transform_4(%arg0: i32) -> (i32, i32) {
    %c0_i32 = arith.constant 0 : i32
    %c0_i32_0 = arith.constant 0 : i32
    return %c0_i32, %arg0 : i32, i32
  }
}

</mosaic_0001>

<bundles_post_ra>
// kernel: tpu_custom_call.1
= control target key start
LH: loop header
LB: loop body
LE: loop exit
PB: predicated region body
PF: predicated region fallthrough
CT: control target
= control target key end

     0   :  { %s1713_s0 = inlined_call_operand.hbm [shape: s32[1,256], index: 0, kind: input, shape index: {}]   ;;  %s1714_s1 = inlined_call_operand.hbm [shape: s32[1,256], index: 1, kind: input, shape index: {}]   ;;  %s1715_s2 = inlined_call_operand.hbm [shape: bf16[128,128], index: 2, kind: input, shape index: {}]   ;;  %s1716_s3 = inlined_call_operand.hbm [shape: bf16[256,128], index: 3, kind: input, shape index: {}]   ;;  %s1717_s4 = inlined_call_operand.hbm [shape: f32[1,256], index: 4, kind: output, shape index: {}]  }
   0x1   :  { %1718 = sst [smem:[#allocation16_spill]] %s1715_s2 }
   0x2   :  { %1719 = sst [smem:[#allocation17_spill]] %s1716_s3 }
   0x3   :  { %9 = vsyncpa [#allocation3], 0 }
   0x4   :  { %11 = vsyncpa [#allocation3 + $0x1], 0 }
   0x5   :  { %12 = vsyncpa [#allocation6], 0 }
   0x6   :  { %14 = vsyncpa [#allocation6 + $0x1], 0 }
   0x7   :  { %15 = vsyncpa [#allocation9], 0 }
   0x8   :  { %16 = vsyncpa [#allocation4], 0 }
   0x9   :  { %18 = vsyncpa [#allocation4 + $0x1], 0  ;;  %s1369_s15 = smov 0   ;;  %s1371_s16 = smov 0  }
   0xa   :  { %s1373_s17 = smov 0   ;;  %s1375_s18 = smov 0  }
   0xb LB: > { %s1720_s2 = sld [smem:[#allocation16_spill]]  ;;  %s1393_s22 = sadd.s32 4294967295, %s1337_s18   ;;  %s1337_s18 = sphi %s1375_s18, %s1754_s18   ;;  %s1333_s17 = sphi %s1373_s17, %s1753_s17   ;;  %s1329_s16 = sphi %s1371_s16, %s1752_s16   ;;  %s1325_s15 = sphi %s1369_s15, %s1751_s15  }
   0xc   : > { %p893_p0 = scmp.ge.s32.totalorder %s1337_s18, 1  ;;  %p45_p1 = scmp.eq.s32.totalorder %s1393_s22, 0 }
   0xd   : > { %p149_p2 = scmp.lt.s32.totalorder %s1337_s18, 3  ;;  %s1339_s24 = smov [#allocation7]  }
   0xe   : > { %s162_s25 = sshll.u32 %s1339_s24, 4  ;;  %s1722_s3 = sld [smem:[#allocation17_spill]]  ;;  %s163_s25 = int_to_ptr.vmem [resolvable:$true] %s162_s25 }
   0xf   : > { %p1398_p3 = pnand %p893_p0, %p149_p2  ;;  %s1340_s29 = smov [#allocation8]  }
  0x10   : > { %s176_s30 = sshll.u32 %s1340_s29, 4  ;;  %s1341_s5 = smov 64   ;;  %s177_s30 = int_to_ptr.vmem [resolvable:$true] %s176_s30 }
  0x11   : > { %s160_s21 = sshll.u32 %s1720_s2, 4  ;;  %p1076_p4 = pneg %p1398_p3  ;;  %s161_s21 = int_to_ptr.hbm [resolvable:$true] %s160_s21 }
  0x12   : > { %s1342_s6 = smov 4   ;;  %s892_s7 = sadd.s32 4294967294, %s1337_s18  }
  0x13   : > { %p1077_p6 = pnand %p1076_p4, %p45_p1  ;;  %s1412_s8 = sadd.s32 1, %s1337_s18  }
  0x14   : > { %s174_s28 = sshll.u32 %s1722_s3, 4  ;;  %s28_s9 = ssub.s32 %s1337_s18, %s1412_s8  ;;  %s175_s28 = int_to_ptr.hbm [resolvable:$true] %s174_s28 }
  0x15   : > { %1079 = dma.hbm_to_vmem [thread:$0]  (!%p1077_p6), %s161_s21, 1024, %s163_s25, [#allocation6], %s1341_s5, %s1341_s5, %s1342_s6  }
  0x16   : > { %1082 = dma.hbm_to_vmem [thread:$0]  (!%p1077_p6), %s175_s28, 2048, %s177_s30, [#allocation9], %s1341_s5, %s1341_s5, %s1342_s6  }
  0x17   : > { %s31_s10 = sadd.s32 1, %s1333_s17  ;;  %p29_p7 = scmp.eq.s32.totalorder %s28_s9, 0 }
  0x18   : > { %p38_p8 = scmp.ne.s32.totalorder %s1333_s17, %s1329_s16  ;;  %p39_p9 = scmp.eq.s32.totalorder %s1337_s18, 0 }
  0x19   : > { %p44_p10 = scmp.ne.s32.totalorder %s1329_s16, %s1325_s15  ;;  %p136_p13 = scmp.eq.s32.totalorder %s1393_s22, 1 }
  0x1a   : > { %s1423_s11 = scalar_select %p29_p7, %s1333_s17, %s31_s10  }
  0x1b   : > { %p1425_p11 = por %p39_p9, %p38_p8  ;;  %p1431_p12 = por %p45_p1, %p44_p10 }
  0x1c   : > { %p142_p0 = scmp.eq.s32.totalorder %s892_s7, 1  ;;  %p1096_p2 = scmp.lt.s32.totalorder %s1337_s18, 2 }
  0x1d   : > { %s190_s14 = sand.u32 1, %s1333_s17   ;;  %p1438_p4 = por %p136_p13, %p38_p8 }
  0x1e   : > { %p1442_p6 = por %p142_p0, %p44_p10  ;;  %s196_s25 = scalar_lea.hbm %s1713_s0, %s1337_s18 }
  0x1f   : > { %s193_s26 = scalar_lea.vmem [#allocation2], %s190_s14  ;;  %s198_s28 = sshll.u32 %s196_s25, 4  ;;  %s199_s28 = int_to_ptr.hbm [resolvable:$true] %s198_s28 }
  0x20   : > { %s200_s27 = sshll.u32 %s193_s26, 4  ;;  %p1452_p7 = pnand %p1096_p2, %p1425_p11  ;;  %s201_s27 = int_to_ptr.vmem [resolvable:$true] %s200_s27 }
  0x21   : > { %s207_s30 = sand.u32 1, %s1337_s18   ;;  %s191_s5 = scalar_lea.sflag [#allocation3], %s190_s14 }
  0x22   : > { %s1199_s6 = sshra.s32 %s199_s28, 4  ;;  %p1203_p9 = pneg %p1452_p7  ;;  %s1200_s6 = int_to_ptr.hbm [resolvable:$true] %s1199_s6 }
  0x23   : > { %s1201_s7 = scalar_lea.hbm %s1200_s6, 1  ;;  %s1206_s12 = scalar_lea.hbm %s1713_s0, 2 }
  0x24   : > { %p1202_p8 = scmp.ne.s32.totalorder %s1200_s6, %s1201_s7  ;;  %p1207_p11 = scmp.lt.s32.totalorder %s1200_s6, %s1713_s0 }
  0x25   : > { %p1208_p0 = scmp.lt.s32.totalorder %s1206_s12, %s1201_s7 }
  0x26   : > { %p1204_p10 = pnand %p1203_p9, %p1202_p8 }
  0x27   : > { %p1209_p2 = por %p1208_p0, %p1207_p11 }
  0x28   : > { %p1205_p13 = pneg %p1204_p10 }
  0x2a   : > { %p1210_p5 = pnand %p1209_p2, %p1205_p13 }
  0x2c   : > { %1213 = shalt.err (!%p1210_p5)
}
  0x2d   : > { %1086 = dma.hbm_to_vmem [thread:$0]  (!%p1452_p7), %s199_s28, 16, %s201_s27, %s191_s5  }
  0x2e   : > { %s213_s2 = scalar_lea.hbm %s1714_s1, %s1337_s18  ;;  %s210_s3 = scalar_lea.vmem [#allocation5], %s190_s14 }
  0x2f   : > { %s217_s9 = sshll.u32 %s210_s3, 4  ;;  %s215_s10 = sshll.u32 %s213_s2, 4  ;;  %s218_s9 = int_to_ptr.vmem [resolvable:$true] %s217_s9  ;;  %s216_s10 = int_to_ptr.hbm [resolvable:$true] %s215_s10 }
  0x30   : > { %s208_s21 = scalar_lea.sflag [#allocation6], %s207_s30  ;;  %s1229_s6 = sshra.s32 %s216_s10, 4  ;;  %s1230_s6 = int_to_ptr.hbm [resolvable:$true] %s1229_s6 }
  0x31   : > { %s1231_s7 = scalar_lea.hbm %s1230_s6, 1  ;;  %s1236_s28 = scalar_lea.hbm %s1714_s1, 2 }
  0x32   : > { %p1232_p8 = scmp.ne.s32.totalorder %s1230_s6, %s1231_s7  ;;  %p1237_p13 = scmp.lt.s32.totalorder %s1230_s6, %s1714_s1 }
  0x33   : > { %p1238_p11 = scmp.lt.s32.totalorder %s1236_s28, %s1231_s7 }
  0x34   : > { %p1234_p5 = pnand %p1232_p8, %p1203_p9 }
  0x35   : > { %p1239_p0 = por %p1238_p11, %p1237_p13 }
  0x36   : > { %p1235_p10 = pneg %p1234_p5 }
  0x38   : > { %p1240_p2 = pnand %p1239_p0, %p1235_p10 }
  0x3a   : > { %1243 = shalt.err (!%p1240_p2)
}
  0x3b   : > { %1089 = dma.hbm_to_vmem [thread:$0]  (!%p1452_p7), %s216_s10, 16, %s218_s9, %s208_s21  }
  0x3c   : > { %226 = sbr.rel (%p1398_p3) target bundleno = 610 (0x262), region = 36  ;;  %s1488_s2 = sand.u32 (!%p1398_p3), 1, %s1329_s16  }
  0x3d   : > { %s229_s3 = scalar_lea.sflag (!%p1398_p3), [#allocation3], %s1488_s2  ;;  %s231_s14 = scalar_lea.vmem (!%p1398_p3), [#allocation2], %s1488_s2 }
  0x41   : > { %1304 = dma.done.wait (%p1431_p12), %s229_s3, 16  }
  0x42   : > { %1306 = vsyncadd (%p1431_p12), %s229_s3, 4294967280  ;;  %s237_s29 = sand.u32 1, %s1393_s22   ;;  %s240_s23 = scalar_lea.vmem [#allocation5], %s1488_s2 }
  0x43   : > { %s238_s30 = scalar_lea.sflag [#allocation6], %s237_s29 }
  0x44   : > { %1308 = dma.done.wait (%p1431_p12), %s238_s30, 16  }
  0x45   : > { %1310 = vsyncadd (%p1431_p12), %s238_s30, 4294967280 }
  0x46   : > { %1312 = dma.done.wait (%p45_p1), [#allocation6], 1024  }
  0x47   : > { %1314 = vsyncadd (%p45_p1), [#allocation6], 4294966272 }
  0x48   : > { %1316 = dma.done.wait (%p45_p1), [#allocation9], 2048  }
  0x49   : > { %1318 = vsyncadd (%p45_p1), [#allocation9], 4294965248  ;;  %v278_v0 = vlaneseq  ;;  %v1515_v5 = vld [vmem:[%s231_s14] ss:$0 sm:$0xff]  ;;  %v1343_v12 = vmov 1.0|1.0   ;;  %s788_s26 = scalar_lea.hbm %s1717_s4, %s1393_s22 }
  0x4a   : > { %v1517_v6 = vld [vmem:[%s240_s23] ss:$0 sm:$0xff]  ;;  %v1014_v31 = vld [vmem:[#allocation7] sm:$0xff]  ;;  %v1020_v32 = vld [vmem:[#allocation7 + $0x30] sm:$0xff]  ;;  %s277_s9 = scalar_lea.vmem [#allocation10], %s1488_s2  ;;  %s792_s21 = sshll.u32 %s788_s26, 4  ;;  %s793_s21 = int_to_ptr.hbm [resolvable:$true] %s792_s21 }
  0x4b   : > { %v1510_v1 = vshrl.u32 %v278_v0, 7  ;;  %v1015_v33 = vld [vmem:[#allocation7 + $0x8] sm:$0xff]  ;;  %v1021_v34 = vld [vmem:[#allocation7 + $0x38] sm:$0xff]  ;;  %v1016_v35 = vld [vmem:[#allocation7 + $0x10] sm:$0xff]  ;;  %s790_s10 = sshll.u32 %s277_s9, 4  ;;  %s780_s6 = scalar_lea.sflag [#allocation4], %s1488_s2  ;;  %s791_s10 = int_to_ptr.vmem [resolvable:$true] %s790_s10 }
  0x4c   : > { %v1017_v36 = vld [vmem:[#allocation7 + $0x18] sm:$0xff]  ;;  %v1018_v37 = vld [vmem:[#allocation7 + $0x20] sm:$0xff]  ;;  %v1019_v38 = vld [vmem:[#allocation7 + $0x28] sm:$0xff]  ;;  %s1273_s7 = sshra.s32 %s793_s21, 4  ;;  %s1279_s22 = scalar_lea.hbm %s1717_s4, 2  ;;  %s1274_s7 = int_to_ptr.hbm [resolvable:$true] %s1273_s7 }
  0x4d   : > { %v293_v2 = vadd.s32 112, %v1510_v1  ;;  %v294_v3 = vadd.s32 120, %v1510_v1  ;;  %v291_v4 = vadd.s32 96, %v1510_v1  ;;  %v292_v7 = vadd.s32 104, %v1510_v1  ;;  %v1022_v63 = vld [vmem:[#allocation8] sm:$0xff]  ;;  %v1028_v0 = vld [vmem:[#allocation8 + $0x30] sm:$0xff]  ;;  %p1280_p7 = scmp.lt.s32.totalorder %s1274_s7, %s1717_s4 }
  0x4e   : > { %v289_v8 = vadd.s32 80, %v1510_v1  ;;  %v290_v10 = vadd.s32 88, %v1510_v1  ;;  %v287_v11 = vadd.s32 64, %v1510_v1  ;;  %v288_v14 = vadd.s32 72, %v1510_v1  ;;  %v1031_v9 = vld [vmem:[#allocation8 + $0x48] sm:$0xff]  ;;  %s1275_s12 = scalar_lea.hbm %s1274_s7, 1 }
  0x4f   : > { %vm311_vm0 = vcmp.eq.s32.totalorder %v293_v2, %v1515_v5  ;;  %vm312_vm1 = vcmp.eq.s32.totalorder %v294_v3, %v1515_v5  ;;  %vm329_vm2 = vcmp.eq.s32.totalorder %v293_v2, %v1517_v6  ;;  %vm330_vm3 = vcmp.eq.s32.totalorder %v294_v3, %v1517_v6  ;;  %v1023_v2 = vld [vmem:[#allocation8 + $0x8] sm:$0xff]  ;;  %v1029_v3 = vld [vmem:[#allocation8 + $0x38] sm:$0xff]  ;;  %p1276_p1 = scmp.ne.s32.totalorder %s1274_s7, %s1275_s12  ;;  %p1281_p9 = scmp.lt.s32.totalorder %s1279_s22, %s1275_s12 }
  0x50   : > { %vm1525_vm4 = vmor %vm311_vm0, %vm329_vm2  ;;  %vm309_vm5 = vcmp.eq.s32.totalorder %v291_v4, %v1515_v5  ;;  %vm327_vm6 = vcmp.eq.s32.totalorder %v291_v4, %v1517_v6  ;;  %vm310_vm8 = vcmp.eq.s32.totalorder %v292_v7, %v1515_v5  ;;  %vm328_vm9 = vcmp.eq.s32.totalorder %v292_v7, %v1517_v6  ;;  %v1035_v4 = vld [vmem:[#allocation8 + $0x68] sm:$0xff]  ;;  %v1036_v7 = vld [vmem:[#allocation8 + $0x70] sm:$0xff] }
  0x51   : > { %vm346_vm7 = vmor %vm312_vm1, %vm330_vm3  ;;  %vm307_vm12 = vcmp.eq.s32.totalorder %v289_v8, %v1515_v5  ;;  %vm325_vm13 = vcmp.eq.s32.totalorder %v289_v8, %v1517_v6  ;;  %vm308_vm15 = vcmp.eq.s32.totalorder %v290_v10, %v1515_v5  ;;  %vm326_vm0 = vcmp.eq.s32.totalorder %v290_v10, %v1517_v6  ;;  %v1025_v8 = vld [vmem:[#allocation8 + $0x18] sm:$0xff]  ;;  %v1027_v13 = vld [vmem:[#allocation8 + $0x28] sm:$0xff]  ;;  %p1277_p3 = pnand %p1276_p1, %p1438_p4  ;;  %p1282_p8 = por %p1281_p9, %p1280_p7 }
  0x52   : > { %vm932_vm10 = vmpackc.low %vm346_vm7, %vm1525_vm4  ;;  %v285_v16 = vadd.s32 48, %v1510_v1  ;;  %vm305_vm3 = vcmp.eq.s32.totalorder %v287_v11, %v1515_v5  ;;  %vm323_vm4 = vcmp.eq.s32.totalorder %v287_v11, %v1517_v6  ;;  %v286_v18 = vadd.s32 56, %v1510_v1  ;;  %v1037_v10 = vld [vmem:[#allocation8 + $0x78] sm:$0xff]  ;;  %v1026_v11 = vld [vmem:[#allocation8 + $0x20] sm:$0xff] }
  0x53   : > { %933 = vmatpush.bf16.msk.msra.mxu0 %vm932_vm10, %v1343_v12  ;;  %vm1538_vm11 = vmor %vm309_vm5, %vm327_vm6  ;;  %1038 = vmatpush.bf16.msk.msra.mxu3 %vm932_vm10, %v1343_v12  ;;  %vm306_vm6 = vcmp.eq.s32.totalorder %v288_v14, %v1515_v5  ;;  %vm324_vm7 = vcmp.eq.s32.totalorder %v288_v14, %v1517_v6  ;;  %v283_v20 = vadd.s32 32, %v1510_v1  ;;  %v284_v22 = vadd.s32 40, %v1510_v1  ;;  %v1033_v14 = vld [vmem:[#allocation8 + $0x58] sm:$0xff]  ;;  %p1278_p12 = pneg %p1277_p3 }
  0x54   : > { %vm1545_vm14 = vmor %vm310_vm8, %vm328_vm9  ;;  %vm303_vm10 = vcmp.eq.s32.totalorder %v285_v16, %v1515_v5  ;;  %v281_v25 = vadd.s32 16, %v1510_v1  ;;  %v282_v27 = vadd.s32 24, %v1510_v1  ;;  %v280_v30 = vadd.s32 8, %v1510_v1 }
  0x55   : > { %vm934_vm1 = vmpackc.low %vm1545_vm14, %vm1538_vm11  ;;  %vm321_vm11 = vcmp.eq.s32.totalorder %v285_v16, %v1517_v6  ;;  %vm322_vm14 = vcmp.eq.s32.totalorder %v286_v18, %v1517_v6  ;;  %p1283_p5 = pnand %p1282_p8, %p1278_p12 }
  0x56   : > { %vm1557_vm2 = vmor %vm307_vm12, %vm325_vm13  ;;  %vm304_vm13 = vcmp.eq.s32.totalorder %v286_v18, %v1515_v5 }
  0x57   : > { %935 = vmatpush.bf16.msk.msra.mxu0 %vm934_vm1, %v1343_v12  ;;  %vm1565_vm5 = vmor %vm308_vm15, %vm326_vm0  ;;  %1039 = vmatpush.bf16.msk.msra.mxu3 %vm934_vm1, %v1343_v12  ;;  %vm301_vm1 = vcmp.eq.s32.totalorder %v283_v20, %v1515_v5 }
  0x58   : > { %vm936_vm8 = vmpackc.low %vm1565_vm5, %vm1557_vm2 }
  0x59   : > { %vm1577_vm9 = vmor %vm305_vm3, %vm323_vm4  ;;  %vm319_vm3 = vcmp.eq.s32.totalorder %v283_v20, %v1517_v6 }
  0x5a   : > { %vm1584_vm12 = vmor %vm306_vm6, %vm324_vm7  ;;  %vm302_vm6 = vcmp.eq.s32.totalorder %v284_v22, %v1515_v5  ;;  %vm320_vm7 = vcmp.eq.s32.totalorder %v284_v22, %v1517_v6 }
  0x5b   : > { %937 = vmatpush.bf16.msk.msra.mxu0 %vm936_vm8, %v1343_v12  ;;  %vm938_vm15 = vmpackc.low %vm1584_vm12, %vm1577_vm9  ;;  %1040 = vmatpush.bf16.msk.msra.mxu3 %vm936_vm8, %v1343_v12  ;;  %vm299_vm8 = vcmp.eq.s32.totalorder %v281_v25, %v1515_v5  ;;  %vm297_vm9 = vcmp.eq.s32.totalorder %v1510_v1, %v1515_v5  ;;  %vm315_vm12 = vcmp.eq.s32.totalorder %v1510_v1, %v1517_v6  ;;  %v1034_v1 = vld [vmem:[#allocation8 + $0x60] sm:$0xff] }
  0x5c   : > { %vm1600_vm0 = vmor %vm303_vm10, %vm321_vm11  ;;  %vm317_vm11 = vcmp.eq.s32.totalorder %v281_v25, %v1517_v6 }
  0x5d   : > { %vm1613_vm4 = vmor %vm304_vm13, %vm322_vm14  ;;  %vm300_vm13 = vcmp.eq.s32.totalorder %v282_v27, %v1515_v5  ;;  %vm318_vm14 = vcmp.eq.s32.totalorder %v282_v27, %v1517_v6 }
  0x5e   : > { %vm940_vm10 = vmpackc.low %vm1613_vm4, %vm1600_vm0  ;;  %vm316_vm4 = vcmp.eq.s32.totalorder %v280_v30, %v1517_v6  ;;  %v1030_v6 = vld [vmem:[#allocation8 + $0x40] sm:$0xff] }
  0x5f   : > { %939 = vmatpush.bf16.msk.msra.mxu0 %vm938_vm15, %v1343_v12  ;;  %vm1630_vm2 = vmor %vm301_vm1, %vm319_vm3  ;;  %1041 = vmatpush.bf16.msk.msra.mxu3 %vm938_vm15, %v1343_v12  ;;  %vm298_vm15 = vcmp.eq.s32.totalorder %v280_v30, %v1515_v5  ;;  %v1024_v5 = vld [vmem:[#allocation8 + $0x10] sm:$0xff] }
  0x60   : > { %vm1634_vm5 = vmor %vm302_vm6, %vm320_vm7 }
  0x61   : > { %vm942_vm0 = vmpackc.low %vm1634_vm5, %vm1630_vm2 }
  0x62   : > { %vm333_vm1 = vmor %vm299_vm8, %vm317_vm11 }
  0x63   : > { %941 = vmatpush.bf16.msk.msra.mxu0 %vm940_vm10, %v1343_v12  ;;  %vm334_vm3 = vmor %vm300_vm13, %vm318_vm14  ;;  %1042 = vmatpush.bf16.msk.msra.mxu3 %vm940_vm10, %v1343_v12 }
  0x64   : > { %vm944_vm6 = vmpackc.low %vm334_vm3, %vm333_vm1 }
  0x65   : > { %vm331_vm7 = vmor %vm297_vm9, %vm315_vm12 }
  0x66   : > { %vm332_vm2 = vmor %vm298_vm15, %vm316_vm4 }
  0x67   : > { %943 = vmatpush.bf16.msk.msra.mxu0 %vm942_vm0, %v1343_v12  ;;  %1043 = vmatpush.bf16.msk.msra.mxu3 %vm942_vm0, %v1343_v12  ;;  %vm946_vm10 = vmpackc.low %vm332_vm2, %vm331_vm7 }
  0x6b   : > { %945 = vmatpush.bf16.msk.msra.mxu0 %vm944_vm6, %v1343_v12  ;;  %1044 = vmatpush.bf16.msk.msra.mxu3 %vm944_vm6, %v1343_v12 }
  0x6f   : > { %947 = vmatpush.bf16.msk.msra.mxu0 %vm946_vm10, %v1343_v12  ;;  %1045 = vmatpush.bf16.msk.msra.mxu3 %vm946_vm10, %v1343_v12  ;;  %v1032_v12 = vld [vmem:[#allocation8 + $0x50] sm:$0xff] }
  0x72   : > { %443 = vmatmul.bf16.vlgmr.msra.gmra.mxu0 %v1014_v31  ;;  %473 = vmatmul.bf16.vlgmr.msra.gmra.mxu3 %v1020_v32 }
  0x82   : > { %448 = vmatmul.bf16.gmra.mxu0 %v1015_v33  ;;  %478 = vmatmul.bf16.gmra.mxu3 %v1021_v34 }
  0x92   : > { %453 = vmatmul.bf16.gmra.mxu0 %v1016_v35 }
  0xa2   : > { %458 = vmatmul.bf16.gmra.mxu0 %v1017_v36 }
  0xb2   : > { %463 = vmatmul.bf16.gmra.mxu0 %v1018_v37 }
  0xc2   : > { %468 = vmatmul.bf16.gmra.mxu0 %v1019_v38 }
  0xef   : > { %v444_v39 = vpop.f32.mrf.mxu0 }
  0xf5   : > { %v474_v40 = vpop.f32.mrf.mxu3 }
  0xf7   : > { %v446_v41 = vpop.f32.mrf.mxu0 }
  0xf8   : > { %v484_v42 = vpack.c.bf16 %v446_v41, %v444_v39 }
  0xfd   : > { %v476_v43 = vpop.f32.mrf.mxu3 }
  0xfe   : > { %v490_v51 = vpack.c.bf16 %v476_v43, %v474_v40 }
  0xff   : > { %v449_v44 = vpop.f32.mrf.mxu0 }
 0x105   : > { %v479_v45 = vpop.f32.mrf.mxu3 }
 0x107   : > { %v451_v46 = vpop.f32.mrf.mxu0 }
 0x108   : > { %v485_v47 = vpack.c.bf16 %v451_v46, %v449_v44 }
 0x10d   : > { %v481_v48 = vpop.f32.mrf.mxu3 }
 0x10e   : > { %v491_v50 = vpack.c.bf16 %v481_v48, %v479_v45 }
 0x10f   : > { %v454_v49 = vpop.f32.mrf.mxu0 }
 0x110   : > { %620 = vmatpush.bf16.msra.mxu1 %v491_v50  ;;  %1046 = vmatpush.bf16.msra.mxu2 %v491_v50 }
 0x111   : > { %1047 = vmatpush.bf16.msrb.mxu3 %v491_v50 }
 0x114   : > { %621 = vmatpush.bf16.msra.mxu1 %v490_v51  ;;  %1048 = vmatpush.bf16.msra.mxu2 %v490_v51 }
 0x115   : > { %1049 = vmatpush.bf16.msrb.mxu3 %v490_v51 }
 0x117   : > { %v456_v52 = vpop.f32.mrf.mxu0 }
 0x118   : > { %v486_v62 = vpack.c.bf16 %v456_v52, %v454_v49 }
 0x11f   : > { %v459_v53 = vpop.f32.mrf.mxu0 }
 0x127   : > { %v461_v54 = vpop.f32.mrf.mxu0 }
 0x128   : > { %v487_v61 = vpack.c.bf16 %v461_v54, %v459_v53 }
 0x12f   : > { %v464_v55 = vpop.f32.mrf.mxu0 }
 0x137   : > { %v466_v56 = vpop.f32.mrf.mxu0 }
 0x138   : > { %v488_v60 = vpack.c.bf16 %v466_v56, %v464_v55 }
 0x13f   : > { %v469_v57 = vpop.f32.mrf.mxu0 }
 0x147   : > { %v471_v58 = vpop.f32.mrf.mxu0 }
 0x148   : > { %v489_v59 = vpack.c.bf16 %v471_v58, %v469_v57 }
 0x14a   : > { %622 = vmatpush.bf16.msra.mxu1 %v489_v59  ;;  %1050 = vmatpush.bf16.msra.mxu2 %v489_v59 }
 0x14b   : > { %1051 = vmatpush.bf16.msrb.mxu3 %v489_v59 }
 0x14e   : > { %623 = vmatpush.bf16.msra.mxu1 %v488_v60  ;;  %1052 = vmatpush.bf16.msra.mxu2 %v488_v60 }
 0x14f   : > { %1053 = vmatpush.bf16.msrb.mxu3 %v488_v60 }
 0x152   : > { %624 = vmatpush.bf16.msra.mxu1 %v487_v61  ;;  %1054 = vmatpush.bf16.msra.mxu2 %v487_v61 }
 0x153   : > { %1055 = vmatpush.bf16.msrb.mxu3 %v487_v61 }
 0x156   : > { %625 = vmatpush.bf16.msra.mxu1 %v486_v62  ;;  %1056 = vmatpush.bf16.msra.mxu2 %v486_v62 }
 0x157   : > { %1057 = vmatpush.bf16.msrb.mxu3 %v486_v62 }
 0x15a   : > { %626 = vmatpush.bf16.msra.mxu1 %v485_v47  ;;  %1058 = vmatpush.bf16.msra.mxu2 %v485_v47 }
 0x15b   : > { %1059 = vmatpush.bf16.msrb.mxu3 %v485_v47 }
 0x15e   : > { %627 = vmatpush.bf16.msra.mxu1 %v484_v42  ;;  %1060 = vmatpush.bf16.msra.mxu2 %v484_v42 }
 0x15f   : > { %1061 = vmatpush.bf16.msrb.mxu3 %v484_v42 }
 0x161   : > { %628 = vmatmul.bf16.vlgmr.msra.gmra.mxu1 %v1022_v63  ;;  %658 = vmatmul.bf16.vlgmr.msra.gmra.mxu2 %v1028_v0 }
 0x162   : > { %688 = vmatmul.bf16.vlgmr.msrb.gmra.mxu3 %v1034_v1 }
 0x171   : > { %633 = vmatmul.bf16.gmra.mxu1 %v1023_v2  ;;  %663 = vmatmul.bf16.gmra.mxu2 %v1029_v3 }
 0x172   : > { %693 = vmatmul.bf16.gmra.mxu3 %v1035_v4 }
 0x181   : > { %638 = vmatmul.bf16.gmra.mxu1 %v1024_v5  ;;  %668 = vmatmul.bf16.gmra.mxu2 %v1030_v6 }
 0x182   : > { %698 = vmatmul.bf16.gmra.mxu3 %v1036_v7 }
 0x191   : > { %643 = vmatmul.bf16.gmra.mxu1 %v1025_v8  ;;  %673 = vmatmul.bf16.gmra.mxu2 %v1031_v9 }
 0x192   : > { %703 = vmatmul.bf16.gmra.mxu3 %v1037_v10 }
 0x1a1   : > { %648 = vmatmul.bf16.gmra.mxu1 %v1026_v11  ;;  %678 = vmatmul.bf16.gmra.mxu2 %v1032_v12 }
 0x1b1   : > { %653 = vmatmul.bf16.gmra.mxu1 %v1027_v13  ;;  %683 = vmatmul.bf16.gmra.mxu2 %v1033_v14 }
 0x1de   : > { %v629_v15 = vpop.f32.mrf.mxu1 }
 0x1df   : > { %v709_v44 = vmax.f32 %v629_v15, 0.0 }
 0x1e4   : > { %v1667_v16 = vpop.f32.mrf.mxu2 }
 0x1e5   : > { %v689_v24 = vpop.f32.mrf.mxu3 }
 0x1e6   : > { %v631_v17 = vpop.f32.mrf.mxu1  ;;  %v733_v10 = vmax.f32 %v689_v24, 0.0 }
 0x1e7   : > { %v710_v41 = vmax.f32 %v631_v17, 0.0 }
 0x1ec   : > { %v1669_v18 = vpop.f32.mrf.mxu2 }
 0x1ed   : > { %v691_v27 = vpop.f32.mrf.mxu3 }
 0x1ee   : > { %v634_v19 = vpop.f32.mrf.mxu1  ;;  %v734_v15 = vmax.f32 %v691_v27, 0.0 }
 0x1ef   : > { %v711_v45 = vmax.f32 %v634_v19, 0.0 }
 0x1f4   : > { %v1671_v20 = vpop.f32.mrf.mxu2 }
 0x1f5   : > { %v694_v31 = vpop.f32.mrf.mxu3 }
 0x1f6   : > { %v636_v21 = vpop.f32.mrf.mxu1 }
 0x1f7   : > { %v712_v48 = vmax.f32 %v636_v21, 0.0 }
 0x1fc   : > { %v1673_v22 = vpop.f32.mrf.mxu2 }
 0x1fd   : > { %v696_v34 = vpop.f32.mrf.mxu3 }
 0x1fe   : > { %v639_v23 = vpop.f32.mrf.mxu1 }
 0x1ff   : > { %v713_v54 = vmax.f32 %v639_v23, 0.0  ;;  %v735_v23 = vmax.f32 %v694_v31, 0.0  ;;  %v723_v31 = vmax.f32 %v1671_v20, 0.0 }
 0x204   : > { %v669_v25 = vpop.f32.mrf.mxu2 }
 0x205   : > { %v699_v37 = vpop.f32.mrf.mxu3  ;;  %v725_v42 = vmax.f32 %v669_v25, 0.0 }
 0x206   : > { %v641_v26 = vpop.f32.mrf.mxu1 }
 0x207   : > { %v741_v49 = vmul.f32 %v725_v42, %v709_v44  ;;  %v714_v59 = vmax.f32 %v641_v26, 0.0  ;;  %v724_v44 = vmax.f32 %v1673_v22, 0.0 }
 0x20c   : > { %v671_v28 = vpop.f32.mrf.mxu2 }
 0x20d   : > { %v726_v40 = vmax.f32 %v671_v28, 0.0  ;;  %v701_v52 = vpop.f32.mrf.mxu3 }
 0x20e   : > { %v644_v29 = vpop.f32.mrf.mxu1 }
 0x20f   : > { %v742_v46 = vmul.f32 %v726_v40, %v710_v41  ;;  %v715_v63 = vmax.f32 %v644_v29, 0.0  ;;  %v736_v29 = vmax.f32 %v696_v34, 0.0  ;;  %v722_v40 = vmax.f32 %v1669_v18, 0.0 }
 0x211   : > { %v757_v55 = vadd.f32 %v742_v46, %v741_v49 }
 0x214   : > { %v674_v30 = vpop.f32.mrf.mxu2 }
 0x215   : > { %v727_v43 = vmax.f32 %v674_v30, 0.0  ;;  %v704_v9 = vpop.f32.mrf.mxu3  ;;  %v737_v30 = vmax.f32 %v699_v37, 0.0 }
 0x216   : > { %v646_v32 = vpop.f32.mrf.mxu1  ;;  %v739_v41 = vmax.f32 %v704_v9, 0.0 }
 0x217   : > { %v743_v50 = vmul.f32 %v727_v43, %v711_v45  ;;  %v716_v5 = vmax.f32 %v646_v32, 0.0 }
 0x218   : > { %v755_v45 = vmul.f32 %v739_v41, %v723_v31 }
 0x219   : > { %v758_v60 = vadd.f32 %v757_v55, %v743_v50 }
 0x21c   : > { %v676_v33 = vpop.f32.mrf.mxu2 }
 0x21d   : > { %v728_v47 = vmax.f32 %v676_v33, 0.0 }
 0x21e   : > { %v649_v35 = vpop.f32.mrf.mxu1 }
 0x21f   : > { %v744_v56 = vmul.f32 %v728_v47, %v712_v48  ;;  %v717_v6 = vmax.f32 %v649_v35, 0.0  ;;  %v721_v35 = vmax.f32 %v1667_v16, 0.0 }
 0x221   : > { %v759_v0 = vadd.f32 %v758_v60, %v744_v56  ;;  %v749_v17 = vmul.f32 %v733_v10, %v717_v6  ;;  %v753_v27 = vmul.f32 %v737_v30, %v721_v35 }
 0x224   : > { %v679_v36 = vpop.f32.mrf.mxu2 }
 0x225   : > { %v729_v51 = vmax.f32 %v679_v36, 0.0  ;;  %v738_v36 = vmax.f32 %v701_v52, 0.0 }
 0x226   : > { %v651_v38 = vpop.f32.mrf.mxu1 }
 0x227   : > { %v745_v61 = vmul.f32 %v729_v51, %v713_v54  ;;  %v718_v11 = vmax.f32 %v651_v38, 0.0  ;;  %v754_v43 = vmul.f32 %v738_v36, %v722_v40 }
 0x229   : > { %v760_v2 = vadd.f32 %v759_v0, %v745_v61  ;;  %v750_v25 = vmul.f32 %v734_v15, %v718_v11 }
 0x22c   : > { %v681_v39 = vpop.f32.mrf.mxu2 }
 0x22d   : > { %v730_v57 = vmax.f32 %v681_v39, 0.0  ;;  %v706_v39 = vpop.f32.mrf.mxu3 }
 0x22e   : > { %v654_v58 = vpop.f32.mrf.mxu1  ;;  %v740_v34 = vmax.f32 %v706_v39, 0.0 }
 0x22f   : > { %v746_v1 = vmul.f32 %v730_v57, %v714_v59  ;;  %v719_v19 = vmax.f32 %v654_v58, 0.0 }
 0x230   : > { %v756_v46 = vmul.f32 %v740_v34, %v724_v44 }
 0x231   : > { %v761_v7 = vadd.f32 %v760_v2, %v746_v1  ;;  %v751_v32 = vmul.f32 %v735_v23, %v719_v19 }
 0x234   : > { %v684_v53 = vpop.f32.mrf.mxu2 }
 0x235   : > { %v731_v62 = vmax.f32 %v684_v53, 0.0 }
 0x236   : > { %v656_v14 = vpop.f32.mrf.mxu1 }
 0x237   : > { %v747_v3 = vmul.f32 %v731_v62, %v715_v63  ;;  %v720_v26 = vmax.f32 %v656_v14, 0.0 }
 0x239   : > { %v762_v12 = vadd.f32 %v761_v7, %v747_v3  ;;  %v752_v24 = vmul.f32 %v736_v29, %v720_v26 }
 0x23c   : > { %v686_v4 = vpop.f32.mrf.mxu2 }
 0x23d   : > { %v732_v8 = vmax.f32 %v686_v4, 0.0 }
 0x23f   : > { %v748_v13 = vmul.f32 %v732_v8, %v716_v5 }
 0x241   : > { %v763_v21 = vadd.f32 %v762_v12, %v748_v13 }
 0x243   : > { %v764_v28 = vadd.f32 %v763_v21, %v749_v17 }
 0x245   : > { %v765_v33 = vadd.f32 %v764_v28, %v750_v25 }
 0x247   : > { %v766_v38 = vadd.f32 %v765_v33, %v751_v32 }
 0x249   : > { %v767_v42 = vadd.f32 %v766_v38, %v752_v24 }
 0x24b   : > { %v768_v37 = vadd.f32 %v767_v42, %v753_v27 }
 0x24d   : > { %v769_v16 = vadd.f32 %v768_v37, %v754_v43 }
 0x24f   : > { %v770_v47 = vadd.f32 %v769_v16, %v755_v45 }
 0x251   : > { %v771_v48 = vadd.f32 %v770_v47, %v756_v46 }
 0x253   : > { %v772_v49 = vrot.slane %v771_v48, 4 }
 0x255   : > { %v773_v18 = vadd.f32 %v772_v49, %v771_v48 }
 0x257   : > { %v774_v50 = vrot.slane %v773_v18, 2 }
 0x259   : > { %v775_v20 = vadd.f32 %v774_v50, %v773_v18 }
 0x25b   : > { %v776_v51 = vrot.slane %v775_v20, 1 }
 0x25d   : > { %v777_v22 = vadd.f32 %v776_v51, %v775_v20 }
 0x25f   : > { %778 = vst [vmem:[%s277_s9] sm:$0x1] %v777_v22 }
 0x260   : > { %1286 = shalt.err (!%p1283_p5)
}
 0x261   : > { %1074 = dma.vmem_to_hbm [thread:$0]  (%p1438_p4), %s791_s10, 16, %s793_s21, %s780_s6  }
 0x262 PF: > { %s804_s2 = sand.u32 1, %s1325_s15   ;;  %p1750_p10 = scmp.ge.s32.totalorder %s1337_s18, 2 }
 0x263   : > { %s805_s3 = scalar_lea.sflag [#allocation4], %s804_s2 }
 0x264   : > { %p1091_p13 = pnand %p1750_p10, %p1442_p6 }
 0x266   : > { %p1092_p11 = pneg %p1091_p13 }
 0x268   : > { %1320 = dma.done.wait (%p1092_p11), %s805_s3, 16  }
 0x269   : > { %1322 = vsyncadd (%p1092_p11), %s805_s3, 4294967280  ;;  %p21_p0 = scmp.ge.s32.totalorder %s1412_s8, 4   ;;  %s1751_s15 = smov %s1329_s16 }
 0x26a   : > { %s1752_s16 = smov %s1333_s17  ;;  %s1753_s17 = smov %s1423_s11 }
 0x26b   : > { %s1754_s18 = smov %s1412_s8  ;;  %23 = sbr.rel (!%p21_p0) target bundleno = 11 (0xb), region = 102 }
 0x270   :  { %810 = vsyncpa [#allocation3], 1 }
 0x271   :  { %812 = vsyncpa [#allocation3 + $0x1], 1 }
 0x272   :  { %813 = vsyncpa [#allocation6], 1 }
 0x273   :  { %815 = vsyncpa [#allocation6 + $0x1], 1 }
 0x274   :  { %816 = vsyncpa [#allocation9], 1 }
 0x275   :  { %817 = vsyncpa [#allocation4], 1 }
 0x276   :  { %819 = vsyncpa [#allocation4 + $0x1], 1 }

</bundles_post_ra>
